<compile_context>
chip_gen: v6e
topology: v6e:2x2x1
jax: 0.10.0
libtpu: 0.0.40
codegen_flags: <defaults>
</compile_context>

<pallas_src>
import functools

import jax
import jax.numpy as jnp
from jax.experimental import pallas as pl
from jax.experimental.pallas import tpu as pltpu


_LANE = 128


def _silu_kernel(x_ref, o_ref, *, compute_dtype, use_tanh):
    x = x_ref[...].astype(compute_dtype)
    if use_tanh:
        # One transcendental (tanh) instead of exp + reciprocal; the extra
        # mul/add land on the 4-wide VALU which has slack.
        sig = 0.5 * (jnp.tanh(x * 0.5) + 1.0)
    else:
        sig = jax.nn.sigmoid(x)
    o_ref[...] = (x * sig).astype(o_ref.dtype)


def _silu_jnp(x, compute_dtype):
    xf = x.astype(compute_dtype)
    return (xf * jax.nn.sigmoid(xf)).astype(x.dtype)


def _tpu_generation():
    try:
        kind = jax.devices()[0].device_kind.lower()
    except Exception:
        return "other"
    if "v7" in kind:
        return "v7x"
    if "v6" in kind:
        return "v6e"
    if "v5" in kind and ("lite" in kind or "v5e" in kind):
        return "v5e"
    return "other"


# block_bytes: per-block-buffer target size.
# vmem_limit: explicit scoped-VMEM override (None => compiler default is enough).
# two_cores:  chip has 2 TensorCores per chip (v7x) -> ensure >=2 grid steps.
_GEN_CONFIG = {
    "v7x":   dict(block_bytes=8 << 20, vmem_limit=48 << 20, two_cores=True,  use_tanh=True),
    "v6e":   dict(block_bytes=6 << 20, vmem_limit=40 << 20, two_cores=False, use_tanh=False),
    "v5e":   dict(block_bytes=3 << 20, vmem_limit=None,     two_cores=False, use_tanh=False),
    "other": dict(block_bytes=2 << 20, vmem_limit=None,     two_cores=False, use_tanh=False),
}


def _sublane_unit(dtype):
    bits = jnp.dtype(dtype).itemsize * 8
    if bits >= 32:
        return 8
    if bits == 16:
        return 16
    return 32


def _round_up(a, b):
    return pl.cdiv(a, b) * b


def _silu_2d_pallas(x2d, compute_dtype, cfg):
    """SiLU over a lane-dense (rows, 128) slab via a 1-D pipelined grid."""
    rows = x2d.shape[0]
    dtype = x2d.dtype
    itemsize = jnp.dtype(dtype).itemsize
    row_unit = _sublane_unit(dtype)

    # Biggest block under the per-generation budget, rounded to the sublane unit.
    tr = max(row_unit,
             (cfg["block_bytes"] // (_LANE * itemsize)) // row_unit * row_unit)
    tr = min(tr, _round_up(rows, row_unit))
    # On 2-TC chips (v7x) make sure the "parallel" grid axis has >= 2 steps so
    # both TensorCores get work; on 1-TC chips keep a single grid step.
    # TODO(synk): verify in an xprof trace that dimension_semantics=("parallel",)
    # shards the 1-D grid across v7x's two TensorCores; switch to
    # pltpu.CORE_PARALLEL / pl.core_map if it does not.
    if cfg["two_cores"] and tr >= rows and rows > 2 * row_unit:
        tr = _round_up(pl.cdiv(rows, 2), row_unit)

    grid = (pl.cdiv(rows, tr),)  # ragged last block is masked by Pallas

    n = rows * _LANE
    cost = pl.CostEstimate(
        flops=4 * n,
        transcendentals=n,
        bytes_accessed=2 * n * itemsize,
    )

    kernel = functools.partial(
        _silu_kernel, compute_dtype=compute_dtype, use_tanh=cfg["use_tanh"])

    cp_kwargs = dict(dimension_semantics=("parallel",))
    if cfg["vmem_limit"] is not None:
        cp_kwargs["vmem_limit_bytes"] = cfg["vmem_limit"]

    return pl.pallas_call(
        kernel,
        out_shape=jax.ShapeDtypeStruct((rows, _LANE), dtype),
        grid_spec=pltpu.PrefetchScalarGridSpec(
            num_scalar_prefetch=0,
            grid=grid,
            in_specs=[pl.BlockSpec((tr, _LANE), lambda i: (i, 0))],
            out_specs=pl.BlockSpec((tr, _LANE), lambda i: (i, 0)),
        ),
        compiler_params=pltpu.CompilerParams(**cp_kwargs),
        cost_estimate=cost,
    )(x2d)


def silu_pallas(x):
    """Elementwise SiLU (x * sigmoid(x)) for any shape; layout preserved."""
    orig_shape = x.shape
    orig_dtype = x.dtype
    n = x.size
    if n == 0:
        return x

    gen = _tpu_generation()
    cfg = _GEN_CONFIG[gen]

    # bf16-native compute on chips with bf16 VPU/EUP (v6e/v7x); f32 elsewhere.
    if orig_dtype == jnp.bfloat16 and gen in ("v6e", "v7x"):
        compute_dtype = jnp.bfloat16
    else:
        compute_dtype = jnp.float32

    x_flat = jnp.ravel(x)
    n_aligned = (n // _LANE) * _LANE

    if n_aligned == 0:
        # Entire tensor is smaller than one lane row: a kernel launch costs
        # more than the tiny jnp op.
        return _silu_jnp(x_flat, compute_dtype).reshape(orig_shape)

    if n_aligned == n:
        # Common case: zero-copy (rows, 128) view, no pad / no slice.
        out_flat = _silu_2d_pallas(
            x_flat.reshape(n // _LANE, _LANE), compute_dtype, cfg).reshape(-1)
    else:
        # Lane-aligned prefix through the kernel; <128-element tail in jnp.
        head = _silu_2d_pallas(
            x_flat[:n_aligned].reshape(n_aligned // _LANE, _LANE),
            compute_dtype, cfg).reshape(-1)
        tail = _silu_jnp(x_flat[n_aligned:], compute_dtype)
        out_flat = jnp.concatenate([head, tail])

    return out_flat.reshape(orig_shape)


if __name__ == "__main__":
    key = jax.random.PRNGKey(0)

    # Primary check: NCHW activation tensor, f32 (matches the PyTorch module).
    x = jax.random.normal(key, (2, 4, 16, 16), dtype=jnp.float32)
    y = silu_pallas(x)
    jax.block_until_ready(y)
    y_ref = x * jax.nn.sigmoid(x)
    assert y.shape == x.shape and y.dtype == x.dtype
    assert jnp.allclose(y, y_ref, atol=1e-5, rtol=1e-5)

    # Ragged-tail check: element count not divisible by 128
    # (prefix goes through the kernel, <128-elem tail through jnp).
    k2 = jax.random.PRNGKey(1)
    x2 = jax.random.normal(k2, (7, 37), dtype=jnp.float32)  # 259 elems
    y2 = silu_pallas(x2)
    jax.block_until_ready(y2)
    assert y2.shape == x2.shape
    assert jnp.allclose(y2, x2 * jax.nn.sigmoid(x2), atol=1e-5, rtol=1e-5)

    # Tiny-tensor check (< 128 elements): pure jnp path.
    x4 = jax.random.normal(k2, (3, 5), dtype=jnp.float32)
    y4 = silu_pallas(x4)
    jax.block_until_ready(y4)
    assert jnp.allclose(y4, x4 * jax.nn.sigmoid(x4), atol=1e-5, rtol=1e-5)

    # bf16 check (native-bf16 compute path on v6e/v7x, f32 path on v5e).
    x3 = jax.random.normal(k2, (2, 4, 16, 16), dtype=jnp.bfloat16)
    y3 = silu_pallas(x3)
    jax.block_until_ready(y3)
    ref3 = (x3.astype(jnp.float32) * jax.nn.sigmoid(x3.astype(jnp.float32))
            ).astype(jnp.bfloat16)
    assert y3.dtype == jnp.bfloat16
    assert jnp.allclose(y3.astype(jnp.float32), ref3.astype(jnp.float32),
                        atol=2e-2, rtol=2e-2)

    print("KERNEL_OK")
</pallas_src>

<mosaic_0001>
module attributes {stable_mosaic.version = 11 : i64} {
  func.func @_silu_kernel(%arg0: i32, %arg1: memref<16x128xf32, #tpu.memory_space<vmem>>, %arg2: memref<16x128xf32, #tpu.memory_space<vmem>>) attributes {dimension_semantics = [#tpu.dimension_semantics<parallel>], iteration_bounds = array<i64: 1>, scalar_prefetch = 0 : i64, scratch_operands = 0 : i64, tpu.core_type = #tpu.core_type<tc>, window_params = [{transform_indices = @transform_0, window_bounds = array<i64: 16, 128>}, {transform_indices = @transform_1, window_bounds = array<i64: 16, 128>}]} {
    %c0 = arith.constant 0 : index
    %c0_0 = arith.constant 0 : index
    %0 = vector.load %arg1[%c0, %c0_0] : memref<16x128xf32, #tpu.memory_space<vmem>>, vector<16x128xf32>
    %1 = arith.negf %0 : vector<16x128xf32>
    %2 = math.exp %1 : vector<16x128xf32>
    %cst = arith.constant 1.000000e+00 : f32
    %3 = vector.broadcast %cst : f32 to vector<16x128xf32>
    %4 = arith.addf %3, %2 : vector<16x128xf32>
    %5 = arith.divf %3, %4 : vector<16x128xf32>
    %6 = arith.mulf %0, %5 : vector<16x128xf32>
    %c0_1 = arith.constant 0 : index
    %c0_2 = arith.constant 0 : index
    %7 = vector.load %arg2[%c0_1, %c0_2] : memref<16x128xf32, #tpu.memory_space<vmem>>, vector<16x128xf32>
    tpu.vector_store %arg2[%c0_1, %c0_2], %6 {strides = array<i32>} : memref<16x128xf32, #tpu.memory_space<vmem>>, vector<16x128xf32>,
    return
  }
  func.func @transform_0(%arg0: i32) -> (i32, i32) {
    %c0_i32 = arith.constant 0 : i32
    %c0_i32_0 = arith.constant 0 : i32
    return %arg0, %c0_i32 : i32, i32
  }
  func.func @transform_1(%arg0: i32) -> (i32, i32) {
    %c0_i32 = arith.constant 0 : i32
    %c0_i32_0 = arith.constant 0 : i32
    return %arg0, %c0_i32 : i32, i32
  }
}

</mosaic_0001>

<bundles_post_ra>
// kernel: tpu_custom_call.1
= control target key start
LH: loop header
LB: loop body
LE: loop exit
PB: predicated region body
PF: predicated region fallthrough
CT: control target
= control target key end

     0   :  { %6 = vsyncpa [#allocation3], 0  ;;  %s142_s0 = inlined_call_operand.hbm [shape: f32[16,128], index: 0, kind: input, shape index: {}]   ;;  %s143_s1 = inlined_call_operand.hbm [shape: f32[16,128], index: 1, kind: output, shape index: {}]  }
   0x1   :  { %7 = vsyncpa [#allocation4], 0  ;;  %s116_s6 = smov [#allocation2]  }
   0x2   :  { %s13_s7 = sshll.u32 %s116_s6, 4  ;;  %s14_s7 = int_to_ptr.vmem [resolvable:$true] %s13_s7 }
   0x3   :  { %s80_s8 = scalar_lea.vmem %s14_s7, 256  ;;  %p85_p1 = scmp.lt.s32.totalorder %s14_s7, %s14_s7 }
   0x4   :  { %p81_p0 = scmp.ne.s32.totalorder %s14_s7, %s80_s8  ;;  %p86_p2 = scmp.lt.s32.totalorder %s80_s8, %s80_s8 }
   0x6   :  { %p87_p3 = por %p86_p2, %p85_p1 }
   0x8   :  { %p88_p4 = pnand %p87_p3, %p81_p0 }
   0xa   :  { %91 = shalt.err (!%p88_p4)
}
   0xb   :  { %s117_s9 = smov 128   ;;  %s118_s10 = smov 8  }
   0xc   :  { %19 = dma.hbm_to_vmem [thread:$0]  %s142_s0, 256, %s14_s7, [#allocation3], %s117_s9, %s117_s9, %s118_s10  }
   0xd   :  { %112 = dma.done.wait [#allocation3], 256  }
   0xe   :  { %113 = vsyncadd [#allocation3], 4294967040  ;;  %v23_v0 = vld [vmem:[#allocation2] sm:$0xff]  ;;  %v24_v1 = vld [vmem:[#allocation2 + $0x8] sm:$0xff]  ;;  %s119_s13 = smov [#allocation5]  }
   0xf   :  { %v58_v2 = vmul.f32 -1.442695, %v23_v0  ;;  %v59_v3 = vmul.f32 -1.442695, %v24_v1  ;;  %s46_s14 = sshll.u32 %s119_s13, 4  ;;  %s47_s14 = int_to_ptr.vmem [resolvable:$true] %s46_s14 }
  0x10   :  { %s92_s0 = scalar_lea.vmem %s47_s14, 256  ;;  %p97_p6 = scmp.lt.s32.totalorder %s47_s14, %s47_s14 }
  0x11   :  { %64 = vpow2.f32 %v58_v2  ;;  %p93_p5 = scmp.ne.s32.totalorder %s47_s14, %s92_s0  ;;  %p98_p7 = scmp.lt.s32.totalorder %s92_s0, %s92_s0 }
  0x12   :  { %66 = vpow2.f32 %v59_v3 }
  0x13   :  { %p99_p8 = por %p98_p7, %p97_p6 }
  0x15   :  { %p100_p9 = pnand %p99_p8, %p93_p5 }
  0x1e   :  { %v65_v4 = vpop.eup %64 }
  0x1f   :  { %v67_v5 = vpop.eup %66  ;;  %v31_v6 = vadd.f32 1.0, %v65_v4 }
  0x20   :  { %v32_v7 = vadd.f32 1.0, %v67_v5 }
  0x21   :  { %68 = vrcp.f32 %v31_v6 }
  0x22   :  { %70 = vrcp.f32 %v32_v7 }
  0x2e   :  { %v69_v8 = vpop.eup %68 }
  0x2f   :  { %v71_v9 = vpop.eup %70  ;;  %v37_v10 = vmul.f32 %v69_v8, %v23_v0 }
  0x30   :  { %v38_v11 = vmul.f32 %v71_v9, %v24_v1 }
  0x31   :  { %39 = vst [vmem:[#allocation5] sm:$0xff] %v37_v10 }
  0x32   :  { %40 = vst [vmem:[#allocation5 + $0x8] sm:$0xff] %v38_v11 }
  0x33   :  { %103 = shalt.err (!%p100_p9)
}
  0x34   :  { %52 = dma.vmem_to_hbm [thread:$0]  %s47_s14, 256, %s143_s1, [#allocation4], %s117_s9, %s117_s9, %s118_s10  }
  0x35   :  { %114 = dma.done.wait [#allocation4], 256  }
  0x36   :  { %115 = vsyncadd [#allocation4], 4294967040 }
  0x37   :  { %56 = vsyncpa [#allocation3], 1 }
  0x38   :  { %57 = vsyncpa [#allocation4], 1 }

</bundles_post_ra>
